<compile_context>
chip_gen: v5e
topology: v5e:2x2
jax: 0.10.0
libtpu: 0.0.40
codegen_flags: <defaults>
</compile_context>

<pallas_src>
import numpy as np
import jax
import jax.numpy as jnp
from jax.experimental import pallas as pl
from jax.experimental.pallas import tpu as pltpu  # noqa: F401  (TPU backend module)


MASK_PENALTY = 1.0e8  # matches the reference's 100000000.0 additive mask


def _rpad8(x):
    return ((int(x) + 7) // 8) * 8


def _lpad128(x):
    return ((int(x) + 127) // 128) * 128


def _full_spec(shape):
    # gridless call -> full-array block, index_map takes no grid indices
    return pl.BlockSpec(shape, lambda: (0,) * len(shape))


def _make_actor_kernel(layout):
    """Fused Actor.forward kernel specialized to the static head/slab layout."""
    (n, IN, H, HH, TK, NH, offsets,
     r_wh, r_w1h, r_auto, r_w2, r_const, rTK, rHH, out_width) = layout

    def kernel(w_ref, x_ref, mask_ref, out_ref):
        f32 = jnp.float32
        x = x_ref[...]                          # (B, IN)
        B = x.shape[0]

        # ---- trunk: relu(Linear(x)) (extra relu in reference is idempotent) ----
        W_h = w_ref[r_wh:r_wh + IN, 0:H]
        b_h = w_ref[r_const + 0:r_const + 1, 0:H]
        hidden = jnp.maximum(jnp.dot(x, W_h, preferred_element_type=f32) + b_h, 0.0)

        # ---- hoisted hidden-path of ALL heads: one stacked matmul ----
        W1h_all = w_ref[r_w1h:r_w1h + H, 0:NH]
        b1_all = w_ref[r_const + 1:r_const + 2, 0:NH]
        z_hid_all = jnp.dot(hidden, W1h_all, preferred_element_type=f32) + b1_all

        # ---- full-width constants (lane offset 0, no per-head slicing) ----
        b2_all = w_ref[r_const + 2:r_const + 3, 0:TK]
        mean = w_ref[r_const + 3:r_const + 4, 0:TK]
        inv_std = w_ref[r_const + 4:r_const + 5, 0:TK]
        mask_all = mask_ref[...] != 0                                   # (B, TK)
        col = jax.lax.broadcasted_iota(jnp.int32, (B, TK), 1)

        # persistent normalized one-hots of completed heads (stays in VMEM)
        norm_buf = jnp.zeros((B, TK), f32)
        acts, logps, ents = [], [], []

        for i in range(n):
            lo, hi = int(offsets[i]), int(offsets[i + 1])

            zb = z_hid_all[:, i * HH:(i + 1) * HH]                      # (B, HH)
            if i > 0:
                r0 = r_auto + (i - 1) * rTK
                # rows >= offsets[i] are zero AND norm_buf cols >= offsets[i] are zero
                W_auto = w_ref[r0:r0 + TK, 0:HH]
                zb = zb + jnp.dot(norm_buf, W_auto, preferred_element_type=f32)
            z = jnp.maximum(zb, 0.0)

            # head output weights embedded at global cols [lo, hi) -> full-width logits
            r2 = r_w2 + i * rHH
            W2 = w_ref[r2:r2 + HH, 0:TK]
            logits = jnp.dot(z, W2, preferred_element_type=f32) + b2_all  # (B, TK)

            # TODO(synk): action_dependencies config (data-dependent dependency masks);
            #             default {} => dependency mask is all-True.
            in_range = jnp.logical_and(col >= lo, col < hi)
            head_mask = jnp.logical_and(mask_all, in_range)
            no_act = jnp.logical_not(jnp.any(head_mask, axis=-1, keepdims=True))
            head_mask = jnp.logical_or(head_mask,
                                       jnp.logical_and(no_act, col == lo))
            masked_logits = logits - jnp.where(head_mask, 0.0, MASK_PENALTY)

            # softmax statistics via logsumexp; exact reciprocal (unbiased entropy)
            m = jnp.max(masked_logits, axis=-1, keepdims=True)          # (B, 1)
            e = jnp.exp(masked_logits - m)                              # (B, TK)
            s = jnp.sum(e, axis=-1, keepdims=True)                      # (B, 1)
            log_s = jnp.log(s)
            probs = e * (1.0 / s)
            logp_all = masked_logits - (m + log_s)

            # deterministic action = argmax (first maximal index), global -> local
            is_max = masked_logits == m
            gidx = jnp.min(jnp.where(is_max, col, TK), axis=-1, keepdims=True)
            acts.append((gidx - lo).astype(f32))
            # chosen logit is the row max -> log_prob(action) = -log(sum exp(shifted))
            logps.append(-log_s)
            ents.append(-jnp.sum(probs * logp_all, axis=-1, keepdims=True))

            # autoregressive feed-forward of this head's normalized one-hot
            if i + 1 < n:
                onehot = (col == gidx).astype(f32)
                norm_oh = jnp.clip((onehot - mean) * inv_std, -5.0, 5.0)
                norm_buf = jnp.where(in_range, norm_oh, norm_buf)

        # combined log-prob reduced in-kernel
        logp_sum = logps[0]
        for lp in logps[1:]:
            logp_sum = logp_sum + lp

        # single lane-dense output slab: [actions | sum_log_prob | entropies | 0...]
        pieces = acts + [logp_sum] + ents
        pad = jnp.zeros((B, out_width - (2 * n + 1)), f32)
        out_ref[...] = jnp.concatenate(pieces + [pad], axis=-1)

    return kernel


class Actor:
    def __init__(self, input_size, action_head_sizes, hidden_size=32, head_hidden=32,
                 key=jax.random.PRNGKey(0)):
        self.input_size = IN = int(input_size)
        self.action_head_sizes = sizes = [int(s) for s in action_head_sizes]
        self.hidden_size = H = int(hidden_size)
        self.head_hidden = HH = int(head_hidden)
        n = len(sizes)
        TK = int(sum(sizes))
        NH = n * HH
        offsets = [0] + list(np.cumsum(sizes).astype(int))
        self._n = n
        self.offsets = offsets

        # ---- raw weights (same init scheme / key consumption as the torch module) ----
        keys = jax.random.split(key, 1 + 2 * n)

        def lin(k, fi, fo, gain):
            return (gain * jax.random.normal(k, (fi, fo), jnp.float32)
                    / jnp.sqrt(jnp.float32(fi)))

        self.w_h = lin(keys[0], IN, H, float(np.sqrt(2.0)))
        self.b_h = jnp.zeros((1, H), jnp.float32)
        self.heads_raw = []
        for i, K in enumerate(sizes):
            head_in = H + offsets[i]            # hidden + previous one-hots
            w1 = lin(keys[1 + 2 * i], head_in, HH, float(np.sqrt(2.0)))
            b1 = jnp.zeros((1, HH), jnp.float32)
            w2 = lin(keys[2 + 2 * i], HH, K, 0.01)
            b2 = jnp.zeros((1, K), jnp.float32)
            self.heads_raw.append((w1, b1, w2, b2))

        # running-stat buffers for autoregressive one-hot normalization (defaults)
        self.action_mean = jnp.zeros((TK,), jnp.float32)
        self.action_var = jnp.ones((TK,), jnp.float32)

        # ---- pack everything into ONE weight slab (built once) ----
        # TODO(synk): update_action_normalization would need to rebuild this slab.
        rIN, rH, rTK, rHH = _rpad8(IN), _rpad8(H), _rpad8(TK), _rpad8(HH)
        LW = _lpad128(max(H, NH, TK, HH))
        r_wh = 0
        r_w1h = r_wh + rIN
        r_auto = r_w1h + rH
        r_w2 = r_auto + max(n - 1, 0) * rTK
        r_const = r_w2 + n * rHH
        R = r_const + 8

        slab = np.zeros((R, LW), np.float32)
        slab[r_wh:r_wh + IN, :H] = np.asarray(self.w_h)
        slab[r_const + 0, :H] = np.asarray(self.b_h)[0]
        for i, K in enumerate(sizes):
            lo, hi = offsets[i], offsets[i + 1]
            w1, b1, w2, b2 = (np.asarray(a) for a in self.heads_raw[i])
            slab[r_w1h:r_w1h + H, i * HH:(i + 1) * HH] = w1[:H]          # hidden block
            if i > 0:                                                     # stacked auto block
                a0 = r_auto + (i - 1) * rTK
                slab[a0:a0 + lo, :HH] = w1[H:]
            w20 = r_w2 + i * rHH                                          # full-width W2
            slab[w20:w20 + HH, lo:hi] = w2
            slab[r_const + 1, i * HH:(i + 1) * HH] = b1[0]
            slab[r_const + 2, lo:hi] = b2[0]
        slab[r_const + 3, :TK] = np.asarray(self.action_mean)
        slab[r_const + 4, :TK] = 1.0 / np.sqrt(np.asarray(self.action_var) + 1e-8)
        self.w_slab = jnp.asarray(slab)

        self.out_width = 128
        assert 2 * n + 1 <= self.out_width

        layout = (n, IN, H, HH, TK, NH, tuple(offsets),
                  r_wh, r_w1h, r_auto, r_w2, r_const, rTK, rHH, self.out_width)
        self._kernel = _make_actor_kernel(layout)

        # advisory cost estimate (per batch row)
        f = 2 * IN * H + 2 * H * NH
        for i in range(n):
            if i > 0:
                f += 2 * TK * HH
            f += 2 * HH * TK
        self._flops_per_row = f
        self._trans_per_row = n * (TK + 3)

        self._forward_jit = jax.jit(self._forward_impl)

    def _forward_impl(self, w_slab, x, mask):
        B = x.shape[0]
        n = self._n
        out_w = self.out_width
        operands = (w_slab, x.astype(jnp.float32), mask.astype(jnp.int32))
        out = pl.pallas_call(
            self._kernel,
            out_shape=jax.ShapeDtypeStruct((B, out_w), jnp.float32),
            in_specs=[_full_spec(o.shape) for o in operands],
            out_specs=_full_spec((B, out_w)),
            cost_estimate=pl.CostEstimate(
                flops=int(B * self._flops_per_row),
                transcendentals=int(B * self._trans_per_row),
                bytes_accessed=int(w_slab.size * 4
                                   + B * (x.shape[1] + mask.shape[1] + out_w) * 4)),
        )(*operands)
        actions = out[:, :n].astype(jnp.int32)                 # (B, n_heads)
        combined_log_probs = out[:, n]                         # (B,)
        combined_entropy = out[:, n + 1:2 * n + 1]             # (B, n_heads)
        return actions, combined_log_probs, combined_entropy

    def forward(self, x, flattened_action_masks):
        acts, logp, ent = self._forward_jit(self.w_slab, x, flattened_action_masks)
        # TODO(synk): th.multinomial stochastic sampling, input_actions and
        #             return_probs paths (deterministic argmax only).
        return acts, logp, ent, None


def _reference_forward(x, masks, actor):
    """Pure-JAX (XLA) replica of the torch semantics, used only for verification."""
    eps = float(jnp.finfo(jnp.float32).eps)
    hidden = jnp.maximum(x @ actor.w_h + actor.b_h, 0.0)
    offs = actor.offsets
    one_hots, acts, lps, ents = [], [], [], []
    for i, (w1, b1, w2, b2) in enumerate(actor.heads_raw):
        cur = hidden
        if i > 0:
            prev = jnp.concatenate(one_hots, axis=-1)
            mean = actor.action_mean[:prev.shape[-1]]
            var = actor.action_var[:prev.shape[-1]]
            prev = jnp.clip((prev - mean) / jnp.sqrt(var + 1e-8), -5.0, 5.0)
            cur = jnp.concatenate([cur, prev], axis=-1)
        z = jnp.maximum(cur @ w1 + b1, 0.0)
        logits = z @ w2 + b2
        m = masks[:, offs[i]:offs[i + 1]].astype(bool)
        no_act = ~jnp.any(m, axis=-1, keepdims=True)
        col = jnp.arange(m.shape[-1])[None, :]
        m = m | (no_act & (col == 0))
        ml = logits - jnp.where(m, 0.0, MASK_PENALTY)
        probs = jax.nn.softmax(ml, axis=-1)
        a = jnp.argmax(probs, axis=-1)
        oh = jax.nn.one_hot(a, m.shape[-1], dtype=jnp.float32)
        cl = jnp.clip(probs, eps, 1.0 - eps)
        lps.append(jnp.sum(jnp.log(cl) * oh, axis=-1))
        ents.append(-jnp.sum(probs * jnp.log(cl), axis=-1))
        acts.append(a)
        one_hots.append(oh)
    return (jnp.stack(acts, axis=1), jnp.stack(lps, axis=1).sum(1),
            jnp.stack(ents, axis=1))


if __name__ == "__main__":
    B = 4
    INPUT_SIZE = 16
    ACTION_HEAD_SIZES = [6, 4]

    key = jax.random.PRNGKey(0)
    k_x, k_m, k_p = jax.random.split(key, 3)

    x = jax.random.normal(k_x, (B, INPUT_SIZE), jnp.float32)
    flattened_action_masks = (
        jax.random.uniform(k_m, (B, sum(ACTION_HEAD_SIZES))) < 0.7
    ).astype(jnp.int32)

    actor = Actor(INPUT_SIZE, ACTION_HEAD_SIZES, key=k_p)
    acts, logp, ent, _ = actor.forward(x, flattened_action_masks)
    jax.block_until_ready((acts, logp, ent))

    assert acts.shape == (B, len(ACTION_HEAD_SIZES))
    assert logp.shape == (B,)
    assert ent.shape == (B, len(ACTION_HEAD_SIZES))

    # correctness vs. pure-JAX reference (tight tol now that reciprocal is exact)
    r_acts, r_logp, r_ent = _reference_forward(x, flattened_action_masks, actor)
    assert bool(jnp.all(acts == r_acts))
    assert bool(jnp.allclose(logp, r_logp, rtol=1e-3, atol=1e-3))
    assert bool(jnp.allclose(ent, r_ent, rtol=1e-3, atol=1e-3))

    print("KERNEL_OK")
</pallas_src>

<mosaic_0001>
module attributes {stable_mosaic.version = 11 : i64} {
  func.func @kernel(%arg0: memref<136x128xf32, #tpu.memory_space<vmem>>, %arg1: memref<4x16xf32, #tpu.memory_space<vmem>>, %arg2: memref<4x10xi32, #tpu.memory_space<vmem>>, %arg3: memref<4x128xf32, #tpu.memory_space<vmem>>) attributes {dimension_semantics = [], scalar_prefetch = 0 : i64, scratch_operands = 0 : i64, tpu.core_type = #tpu.core_type<tc>} {
    %c0 = arith.constant 0 : index
    %c0_0 = arith.constant 0 : index
    %0 = vector.load %arg1[%c0, %c0_0] : memref<4x16xf32, #tpu.memory_space<vmem>>, vector<4x16xf32>
    %c0_1 = arith.constant 0 : index
    %c0_2 = arith.constant 0 : index
    %1 = vector.load %arg0[%c0_1, %c0_2] : memref<136x128xf32, #tpu.memory_space<vmem>>, vector<16x32xf32>
    %c128 = arith.constant 128 : index
    %c0_3 = arith.constant 0 : index
    %2 = vector.load %arg0[%c128, %c0_3] : memref<136x128xf32, #tpu.memory_space<vmem>>, vector<1x32xf32>
    %cst = arith.constant dense<0.000000e+00> : vector<4x32xf32>
    %3 = tpu.matmul %0, %1, %cst {dimension_numbers = #tpu.dot_dimension_numbers<[1], [0], [0], [1], [0, 0, 1, 1], [], []>} : vector<4x16xf32>, vector<16x32xf32>, vector<4x32xf32> -> vector<4x32xf32>
    %4 = vector.broadcast %2 : vector<1x32xf32> to vector<4x32xf32>
    %5 = arith.addf %3, %4 : vector<4x32xf32>
    %cst_4 = arith.constant 0.000000e+00 : f32
    %6 = vector.broadcast %cst_4 : f32 to vector<4x32xf32>
    %7 = arith.maximumf %5, %6 : vector<4x32xf32>
    %c16 = arith.constant 16 : index
    %c0_5 = arith.constant 0 : index
    %8 = vector.load %arg0[%c16, %c0_5] : memref<136x128xf32, #tpu.memory_space<vmem>>, vector<32x64xf32>
    %c129 = arith.constant 129 : index
    %c0_6 = arith.constant 0 : index
    %9 = vector.load %arg0[%c129, %c0_6] : memref<136x128xf32, #tpu.memory_space<vmem>>, vector<1x64xf32>
    %cst_7 = arith.constant dense<0.000000e+00> : vector<4x64xf32>
    %10 = tpu.matmul %7, %8, %cst_7 {dimension_numbers = #tpu.dot_dimension_numbers<[1], [0], [0], [1], [0, 0, 1, 1], [], []>} : vector<4x32xf32>, vector<32x64xf32>, vector<4x64xf32> -> vector<4x64xf32>
    %11 = vector.broadcast %9 : vector<1x64xf32> to vector<4x64xf32>
    %12 = arith.addf %10, %11 : vector<4x64xf32>
    %c130 = arith.constant 130 : index
    %c0_8 = arith.constant 0 : index
    %13 = vector.load %arg0[%c130, %c0_8] : memref<136x128xf32, #tpu.memory_space<vmem>>, vector<1x10xf32>
    %c131 = arith.constant 131 : index
    %c0_9 = arith.constant 0 : index
    %14 = vector.load %arg0[%c131, %c0_9] : memref<136x128xf32, #tpu.memory_space<vmem>>, vector<1x10xf32>
    %c132 = arith.constant 132 : index
    %c0_10 = arith.constant 0 : index
    %15 = vector.load %arg0[%c132, %c0_10] : memref<136x128xf32, #tpu.memory_space<vmem>>, vector<1x10xf32>
    %c0_11 = arith.constant 0 : index
    %c0_12 = arith.constant 0 : index
    %16 = vector.load %arg2[%c0_11, %c0_12] : memref<4x10xi32, #tpu.memory_space<vmem>>, vector<4x10xi32>
    %c0_i32 = arith.constant 0 : i32
    %17 = vector.broadcast %c0_i32 : i32 to vector<4x10xi32>
    %18 = arith.cmpi ne, %16, %17 : vector<4x10xi32>
    %19 = tpu.iota {dimensions = array<i32: 1>} : vector<4x10xi32>
    %cst_13 = arith.constant 0.000000e+00 : f32
    %20 = vector.broadcast %cst_13 : f32 to vector<4x10xf32>
    %21 = vector.extract_strided_slice %12 {offsets = [0, 0], sizes = [4, 32], strides = [1, 1]} : vector<4x64xf32> to vector<4x32xf32>
    %cst_14 = arith.constant 0.000000e+00 : f32
    %22 = vector.broadcast %cst_14 : f32 to vector<4x32xf32>
    %23 = arith.maximumf %21, %22 : vector<4x32xf32>
    %c64 = arith.constant 64 : index
    %c0_15 = arith.constant 0 : index
    %24 = vector.load %arg0[%c64, %c0_15] : memref<136x128xf32, #tpu.memory_space<vmem>>, vector<32x10xf32>
    %cst_16 = arith.constant dense<0.000000e+00> : vector<4x10xf32>
    %25 = tpu.matmul %23, %24, %cst_16 {dimension_numbers = #tpu.dot_dimension_numbers<[1], [0], [0], [1], [0, 0, 1, 1], [], []>} : vector<4x32xf32>, vector<32x10xf32>, vector<4x10xf32> -> vector<4x10xf32>
    %26 = vector.broadcast %13 : vector<1x10xf32> to vector<4x10xf32>
    %27 = arith.addf %25, %26 : vector<4x10xf32>
    %c0_i32_17 = arith.constant 0 : i32
    %28 = vector.broadcast %c0_i32_17 : i32 to vector<4x10xi32>
    %29 = arith.cmpi sge, %19, %28 : vector<4x10xi32>
    %c6_i32 = arith.constant 6 : i32
    %30 = vector.broadcast %c6_i32 : i32 to vector<4x10xi32>
    %31 = arith.cmpi slt, %19, %30 : vector<4x10xi32>
    %32 = arith.andi %29, %31 : vector<4x10xi1>
    %33 = arith.andi %18, %32 : vector<4x10xi1>
    %cst_18 = arith.constant 1.000000e+00 : f32
    %cst_19 = arith.constant 0.000000e+00 : f32
    %34 = vector.broadcast %cst_18 : f32 to vector<4x10xf32>
    %35 = vector.broadcast %cst_19 : f32 to vector<4x10xf32>
    %36 = arith.select %33, %34, %35 : vector<4x10xi1>, vector<4x10xf32>
    %cst_20 = arith.constant dense<0xFF800000> : vector<4xf32>
    %37 = vector.multi_reduction <maximumf>, %36, %cst_20 [1] : vector<4x10xf32> to vector<4xf32>
    %cst_21 = arith.constant 0.000000e+00 : f32
    %38 = vector.broadcast %cst_21 : f32 to vector<4xf32>
    %39 = arith.cmpf ogt, %37, %38 : vector<4xf32>
    %40 = vector.shape_cast %39 : vector<4xi1> to vector<4x1xi1>
    %cst_22 = arith.constant dense<true> : vector<4x1xi1>
    %41 = arith.xori %40, %cst_22 : vector<4x1xi1>
    %c0_i32_23 = arith.constant 0 : i32
    %42 = vector.broadcast %c0_i32_23 : i32 to vector<4x10xi32>
    %43 = arith.cmpi eq, %19, %42 : vector<4x10xi32>
    %44 = vector.broadcast %41 : vector<4x1xi1> to vector<4x10xi1>
    %45 = arith.andi %44, %43 : vector<4x10xi1>
    %46 = arith.ori %33, %45 : vector<4x10xi1>
    %cst_24 = arith.constant 0.000000e+00 : f32
    %cst_25 = arith.constant 1.000000e+08 : f32
    %47 = vector.broadcast %cst_24 : f32 to vector<4x10xf32>
    %48 = vector.broadcast %cst_25 : f32 to vector<4x10xf32>
    %49 = arith.select %46, %47, %48 : vector<4x10xi1>, vector<4x10xf32>
    %50 = arith.subf %27, %49 : vector<4x10xf32>
    %cst_26 = arith.constant dense<0xFF800000> : vector<4xf32>
    %51 = vector.multi_reduction <maximumf>, %50, %cst_26 [1] : vector<4x10xf32> to vector<4xf32>
    %52 = vector.shape_cast %51 : vector<4xf32> to vector<4x1xf32>
    %53 = vector.broadcast %52 : vector<4x1xf32> to vector<4x10xf32>
    %54 = arith.subf %50, %53 : vector<4x10xf32>
    %55 = math.exp %54 : vector<4x10xf32>
    %cst_27 = arith.constant dense<0.000000e+00> : vector<4xf32>
    %56 = vector.multi_reduction <add>, %55, %cst_27 [1] : vector<4x10xf32> to vector<4xf32>
    %57 = vector.shape_cast %56 : vector<4xf32> to vector<4x1xf32>
    %58 = math.log %57 : vector<4x1xf32>
    %cst_28 = arith.constant 1.000000e+00 : f32
    %59 = vector.broadcast %cst_28 : f32 to vector<4x1xf32>
    %60 = arith.divf %59, %57 : vector<4x1xf32>
    %61 = vector.broadcast %60 : vector<4x1xf32> to vector<4x10xf32>
    %62 = arith.mulf %55, %61 : vector<4x10xf32>
    %63 = arith.addf %52, %58 : vector<4x1xf32>
    %64 = vector.broadcast %63 : vector<4x1xf32> to vector<4x10xf32>
    %65 = arith.subf %50, %64 : vector<4x10xf32>
    %66 = vector.broadcast %52 : vector<4x1xf32> to vector<4x10xf32>
    %67 = arith.cmpf oeq, %50, %66 : vector<4x10xf32>
    %c10_i32 = arith.constant 10 : i32
    %68 = vector.broadcast %c10_i32 : i32 to vector<4x10xi32>
    %69 = arith.select %67, %19, %68 : vector<4x10xi1>, vector<4x10xi32>
    %cst_29 = arith.constant dense<2147483647> : vector<4xi32>
    %70 = vector.multi_reduction <minsi>, %69, %cst_29 [1] : vector<4x10xi32> to vector<4xi32>
    %71 = vector.shape_cast %70 : vector<4xi32> to vector<4x1xi32>
    %c0_i32_30 = arith.constant 0 : i32
    %72 = vector.broadcast %c0_i32_30 : i32 to vector<4x1xi32>
    %73 = arith.subi %71, %72 : vector<4x1xi32>
    %74 = arith.sitofp %73 : vector<4x1xi32> to vector<4x1xf32>
    %cst_31 = arith.constant 0.000000e+00 : f32
    %75 = vector.broadcast %cst_31 : f32 to vector<4x1xf32>
    %76 = arith.subf %75, %58 : vector<4x1xf32>
    %77 = arith.mulf %62, %65 : vector<4x10xf32>
    %cst_32 = arith.constant dense<0.000000e+00> : vector<4xf32>
    %78 = vector.multi_reduction <add>, %77, %cst_32 [1] : vector<4x10xf32> to vector<4xf32>
    %79 = vector.shape_cast %78 : vector<4xf32> to vector<4x1xf32>
    %cst_33 = arith.constant 0.000000e+00 : f32
    %80 = vector.broadcast %cst_33 : f32 to vector<4x1xf32>
    %81 = arith.subf %80, %79 : vector<4x1xf32>
    %82 = vector.broadcast %71 : vector<4x1xi32> to vector<4x10xi32>
    %83 = arith.cmpi eq, %19, %82 : vector<4x10xi32>
    %84 = arith.extui %83 : vector<4x10xi1> to vector<4x10xi32>
    %85 = arith.sitofp %84 : vector<4x10xi32> to vector<4x10xf32>
    %86 = vector.broadcast %14 : vector<1x10xf32> to vector<4x10xf32>
    %87 = arith.subf %85, %86 : vector<4x10xf32>
    %88 = vector.broadcast %15 : vector<1x10xf32> to vector<4x10xf32>
    %89 = arith.mulf %87, %88 : vector<4x10xf32>
    %cst_34 = arith.constant -5.000000e+00 : f32
    %cst_35 = arith.constant 5.000000e+00 : f32
    %90 = vector.broadcast %cst_34 : f32 to vector<4x10xf32>
    %91 = arith.maximumf %90, %89 : vector<4x10xf32>
    %92 = vector.broadcast %cst_35 : f32 to vector<4x10xf32>
    %93 = arith.minimumf %92, %91 : vector<4x10xf32>
    %94 = arith.select %32, %93, %20 : vector<4x10xi1>, vector<4x10xf32>
    %95 = vector.extract_strided_slice %12 {offsets = [0, 32], sizes = [4, 32], strides = [1, 1]} : vector<4x64xf32> to vector<4x32xf32>
    %c48 = arith.constant 48 : index
    %c0_36 = arith.constant 0 : index
    %96 = vector.load %arg0[%c48, %c0_36] : memref<136x128xf32, #tpu.memory_space<vmem>>, vector<10x32xf32>
    %cst_37 = arith.constant dense<0.000000e+00> : vector<4x32xf32>
    %97 = tpu.matmul %94, %96, %cst_37 {dimension_numbers = #tpu.dot_dimension_numbers<[1], [0], [0], [1], [0, 0, 1, 1], [], []>} : vector<4x10xf32>, vector<10x32xf32>, vector<4x32xf32> -> vector<4x32xf32>
    %98 = arith.addf %95, %97 : vector<4x32xf32>
    %cst_38 = arith.constant 0.000000e+00 : f32
    %99 = vector.broadcast %cst_38 : f32 to vector<4x32xf32>
    %100 = arith.maximumf %98, %99 : vector<4x32xf32>
    %c96 = arith.constant 96 : index
    %c0_39 = arith.constant 0 : index
    %101 = vector.load %arg0[%c96, %c0_39] : memref<136x128xf32, #tpu.memory_space<vmem>>, vector<32x10xf32>
    %cst_40 = arith.constant dense<0.000000e+00> : vector<4x10xf32>
    %102 = tpu.matmul %100, %101, %cst_40 {dimension_numbers = #tpu.dot_dimension_numbers<[1], [0], [0], [1], [0, 0, 1, 1], [], []>} : vector<4x32xf32>, vector<32x10xf32>, vector<4x10xf32> -> vector<4x10xf32>
    %103 = vector.broadcast %13 : vector<1x10xf32> to vector<4x10xf32>
    %104 = arith.addf %102, %103 : vector<4x10xf32>
    %c6_i32_41 = arith.constant 6 : i32
    %105 = vector.broadcast %c6_i32_41 : i32 to vector<4x10xi32>
    %106 = arith.cmpi sge, %19, %105 : vector<4x10xi32>
    %c10_i32_42 = arith.constant 10 : i32
    %107 = vector.broadcast %c10_i32_42 : i32 to vector<4x10xi32>
    %108 = arith.cmpi slt, %19, %107 : vector<4x10xi32>
    %109 = arith.andi %106, %108 : vector<4x10xi1>
    %110 = arith.andi %18, %109 : vector<4x10xi1>
    %cst_43 = arith.constant 1.000000e+00 : f32
    %cst_44 = arith.constant 0.000000e+00 : f32
    %111 = vector.broadcast %cst_43 : f32 to vector<4x10xf32>
    %112 = vector.broadcast %cst_44 : f32 to vector<4x10xf32>
    %113 = arith.select %110, %111, %112 : vector<4x10xi1>, vector<4x10xf32>
    %cst_45 = arith.constant dense<0xFF800000> : vector<4xf32>
    %114 = vector.multi_reduction <maximumf>, %113, %cst_45 [1] : vector<4x10xf32> to vector<4xf32>
    %cst_46 = arith.constant 0.000000e+00 : f32
    %115 = vector.broadcast %cst_46 : f32 to vector<4xf32>
    %116 = arith.cmpf ogt, %114, %115 : vector<4xf32>
    %117 = vector.shape_cast %116 : vector<4xi1> to vector<4x1xi1>
    %cst_47 = arith.constant dense<true> : vector<4x1xi1>
    %118 = arith.xori %117, %cst_47 : vector<4x1xi1>
    %c6_i32_48 = arith.constant 6 : i32
    %119 = vector.broadcast %c6_i32_48 : i32 to vector<4x10xi32>
    %120 = arith.cmpi eq, %19, %119 : vector<4x10xi32>
    %121 = vector.broadcast %118 : vector<4x1xi1> to vector<4x10xi1>
    %122 = arith.andi %121, %120 : vector<4x10xi1>
    %123 = arith.ori %110, %122 : vector<4x10xi1>
    %cst_49 = arith.constant 0.000000e+00 : f32
    %cst_50 = arith.constant 1.000000e+08 : f32
    %124 = vector.broadcast %cst_49 : f32 to vector<4x10xf32>
    %125 = vector.broadcast %cst_50 : f32 to vector<4x10xf32>
    %126 = arith.select %123, %124, %125 : vector<4x10xi1>, vector<4x10xf32>
    %127 = arith.subf %104, %126 : vector<4x10xf32>
    %cst_51 = arith.constant dense<0xFF800000> : vector<4xf32>
    %128 = vector.multi_reduction <maximumf>, %127, %cst_51 [1] : vector<4x10xf32> to vector<4xf32>
    %129 = vector.shape_cast %128 : vector<4xf32> to vector<4x1xf32>
    %130 = vector.broadcast %129 : vector<4x1xf32> to vector<4x10xf32>
    %131 = arith.subf %127, %130 : vector<4x10xf32>
    %132 = math.exp %131 : vector<4x10xf32>
    %cst_52 = arith.constant dense<0.000000e+00> : vector<4xf32>
    %133 = vector.multi_reduction <add>, %132, %cst_52 [1] : vector<4x10xf32> to vector<4xf32>
    %134 = vector.shape_cast %133 : vector<4xf32> to vector<4x1xf32>
    %135 = math.log %134 : vector<4x1xf32>
    %cst_53 = arith.constant 1.000000e+00 : f32
    %136 = vector.broadcast %cst_53 : f32 to vector<4x1xf32>
    %137 = arith.divf %136, %134 : vector<4x1xf32>
    %138 = vector.broadcast %137 : vector<4x1xf32> to vector<4x10xf32>
    %139 = arith.mulf %132, %138 : vector<4x10xf32>
    %140 = arith.addf %129, %135 : vector<4x1xf32>
    %141 = vector.broadcast %140 : vector<4x1xf32> to vector<4x10xf32>
    %142 = arith.subf %127, %141 : vector<4x10xf32>
    %143 = vector.broadcast %129 : vector<4x1xf32> to vector<4x10xf32>
    %144 = arith.cmpf oeq, %127, %143 : vector<4x10xf32>
    %c10_i32_54 = arith.constant 10 : i32
    %145 = vector.broadcast %c10_i32_54 : i32 to vector<4x10xi32>
    %146 = arith.select %144, %19, %145 : vector<4x10xi1>, vector<4x10xi32>
    %cst_55 = arith.constant dense<2147483647> : vector<4xi32>
    %147 = vector.multi_reduction <minsi>, %146, %cst_55 [1] : vector<4x10xi32> to vector<4xi32>
    %148 = vector.shape_cast %147 : vector<4xi32> to vector<4x1xi32>
    %c6_i32_56 = arith.constant 6 : i32
    %149 = vector.broadcast %c6_i32_56 : i32 to vector<4x1xi32>
    %150 = arith.subi %148, %149 : vector<4x1xi32>
    %151 = arith.sitofp %150 : vector<4x1xi32> to vector<4x1xf32>
    %cst_57 = arith.constant 0.000000e+00 : f32
    %152 = vector.broadcast %cst_57 : f32 to vector<4x1xf32>
    %153 = arith.subf %152, %135 : vector<4x1xf32>
    %154 = arith.mulf %139, %142 : vector<4x10xf32>
    %cst_58 = arith.constant dense<0.000000e+00> : vector<4xf32>
    %155 = vector.multi_reduction <add>, %154, %cst_58 [1] : vector<4x10xf32> to vector<4xf32>
    %156 = vector.shape_cast %155 : vector<4xf32> to vector<4x1xf32>
    %cst_59 = arith.constant 0.000000e+00 : f32
    %157 = vector.broadcast %cst_59 : f32 to vector<4x1xf32>
    %158 = arith.subf %157, %156 : vector<4x1xf32>
    %159 = arith.addf %76, %153 : vector<4x1xf32>
    %cst_60 = arith.constant 0.000000e+00 : f32
    %160 = vector.broadcast %cst_60 : f32 to vector<4x123xf32>
    %161 = tpu.concatenate %74, %151, %159, %81, %158, %160 in 1 : vector<4x1xf32>, vector<4x1xf32>, vector<4x1xf32>, vector<4x1xf32>, vector<4x1xf32>, vector<4x123xf32> -> vector<4x128xf32>
    %c0_61 = arith.constant 0 : index
    %c0_62 = arith.constant 0 : index
    %162 = vector.load %arg3[%c0_61, %c0_62] : memref<4x128xf32, #tpu.memory_space<vmem>>, vector<4x128xf32>
    tpu.vector_store %arg3[%c0_61, %c0_62], %161 {strides = array<i32>} : memref<4x128xf32, #tpu.memory_space<vmem>>, vector<4x128xf32>,
    return
  }
}

</mosaic_0001>

<bundles_post_ra>
// kernel: _forward_impl.1
= control target key start
LH: loop header
LB: loop body
LE: loop exit
PB: predicated region body
PF: predicated region fallthrough
CT: control target
= control target key end

     0   :  { %8 = vsyncpa [#allocation3], 0  ;;  %s616_s0 = inlined_call_operand.hbm [shape: f32[136,128], index: 0, kind: input, shape index: {}]   ;;  %s617_s1 = inlined_call_operand.hbm [shape: f32[4,16], index: 1, kind: input, shape index: {}]   ;;  %s618_s2 = inlined_call_operand.hbm [shape: s32[4,10], index: 2, kind: input, shape index: {}]   ;;  %s619_s3 = inlined_call_operand.vmem [shape: f32[4,128], index: 3, kind: output, shape index: {}]  }
   0x1   :  { %9 = vsyncpa [#allocation5], 0  ;;  %s28_s14 = sshll.u32 %s617_s1, 4  ;;  %s500_s15 = smov [#allocation4]   ;;  %s29_s14 = int_to_ptr.hbm [resolvable:$true] %s28_s14 }
   0x2   :  { %s30_s16 = sshll.u32 %s500_s15, 4  ;;  %s14_s19 = sshll.u32 %s616_s0, 4  ;;  %s31_s16 = int_to_ptr.vmem [resolvable:$true] %s30_s16  ;;  %s15_s19 = int_to_ptr.hbm [resolvable:$true] %s14_s19 }
   0x3   :  { %33 = dma.hbm_to_vmem [thread:$0]  %s29_s14, 64, %s31_s16, [#allocation5]  }
   0x4   :  { %s501_s20 = smov [#allocation2]   ;;  %s502_s22 = smov 128  }
   0x5   :  { %s16_s21 = sshll.u32 %s501_s20, 4  ;;  %s503_s23 = smov 8   ;;  %s17_s21 = int_to_ptr.vmem [resolvable:$true] %s16_s21 }
   0x6   :  { %22 = dma.hbm_to_vmem [thread:$0]  %s15_s19, 2176, %s17_s21, [#allocation3], %s502_s22, %s502_s22, %s503_s23  }
   0x7   :  { %s39_s1 = sshll.u32 %s618_s2, 4  ;;  %s504_s26 = smov [#allocation6]   ;;  %s40_s1 = int_to_ptr.hbm [resolvable:$true] %s39_s1 }
   0x8   :  { %s41_s27 = sshll.u32 %s504_s26, 4  ;;  %s42_s27 = int_to_ptr.vmem [resolvable:$true] %s41_s27 }
   0x9   :  { %44 = dma.hbm_to_vmem [thread:$0]  %s40_s1, 64, %s42_s27, [#allocation5]  }
   0xa   :  { %496 = dma.done.wait [#allocation3], 2176  }
   0xb   :  { %497 = vsyncadd [#allocation3], 4294965120 }
   0xc   :  { %498 = dma.done.wait [#allocation5], 128  }
   0xd   :  { %499 = vsyncadd [#allocation5], 4294967168  ;;  %v59_v0 = vld [vmem:[#allocation2 + $0x8] sm:$0xff]  ;;  %v58_v1 = vld [vmem:[#allocation2] sm:$0xff]  ;;  %vm62_vm0 = vcmask 130048   ;;  %vm93_vm1 = vcmask 261120   ;;  %v122_v16 = vlaneseq }
   0xe   :  { %80 = vmatpush.msra.mxu0 %v59_v0  ;;  %v57_v2 = vld [vmem:[#allocation4] sm:$0xf]  ;;  %v89_v4 = vld [vmem:[#allocation2 + $0x20] sm:$0xff]  ;;  %v88_v5 = vld [vmem:[#allocation2 + $0x18] sm:$0xff]  ;;  %vm158_vm4 = vcmask 76800   ;;  %v505_v19 = vmov 0.0  }
   0xf   :  { %v90_v3 = vld [vmem:[#allocation2 + $0x28] sm:$0xff]  ;;  %v87_v6 = vld [vmem:[#allocation2 + $0x10] sm:$0xff]  ;;  %v128_v7 = vld [vmem:[#allocation2 + $0x58] sm:$0xff]  ;;  %v543_v17 = vand.u32 127, %v122_v16  ;;  %vm506_vm8 = vmmov 1   ;;  %vm240_vm14 = vcmask 1041408  }
  0x10   :  { %109 = vmatpush.msra.mxu1 %v90_v3  ;;  %81 = vmatpush.msra.mxu0 %v58_v1  ;;  %v407_v8 = vld [vmem:[#allocation2 + $0x80] ss:$0 sm:$0xff]  ;;  %v127_v12 = vld [vmem:[#allocation2 + $0x50] sm:$0xff]  ;;  %v126_v13 = vld [vmem:[#allocation2 + $0x48] sm:$0xff]  ;;  %v507_v29 = vmov 1e+08  }
  0x11   :  { %388 = vmatmul.msk.f32.vlgmr.msra.gmra.mxu0 %vm62_vm0, %v57_v2  ;;  %145 = vmatpush.msra.mxu2 %v128_v7  ;;  %v125_v14 = vld [vmem:[#allocation2 + $0x40] sm:$0xff]  ;;  %v540_v15 = vld [vmem:[#allocation6] sm:$0xf]  ;;  %vm154_vm3 = vcmp.lt.s32.totalorder %v543_v17, 6  ;;  %vm164_vm7 = vcmp.eq.s32.totalorder %v543_v17, 0  ;;  %v234_v44 = vld [vmem:[#allocation2 + $0x30] sm:$0xff] }
  0x12   :  { %110 = vmatpush.msra.mxu1 %v89_v4  ;;  %vm121_vm2 = vcmp.ne.s32.totalorder %v540_v15, 0  ;;  %v408_v22 = vld [vmem:[#allocation2 + $0x81] ss:$0 sm:$0xff]  ;;  %v563_v27 = vld [vmem:[#allocation2 + $0x82] ss:$0 sm:$0xff]  ;;  %vm236_vm0 = vcmask 80896  }
  0x13   :  { %146 = vmatpush.msra.mxu2 %v127_v12  ;;  %vm550_vm5 = vmand %vm121_vm2, %vm154_vm3  ;;  %v235_v43 = vld [vmem:[#allocation2 + $0x38] sm:$0x3]  ;;  %v410_v50 = vld [vmem:[#allocation2 + $0x83] ss:$0 sm:$0xff]  ;;  %s508_s0 = smov 32   ;;  %s509_s2 = smov 96  }
  0x14   :  { %111 = vmatpush.msra.mxu1 %v88_v5  ;;  %v157_v20 = vsel %vm550_vm5, 1.0, %v505_v19  ;;  %393 = vmatpush.msk.msra.mxu3 %vm240_vm14, %v235_v43  ;;  %v411_v51 = vld [vmem:[#allocation2 + $0x84] ss:$0 sm:$0xff]  ;;  %v273_v61 = vld [vmem:[#allocation2 + $0x78] sm:$0xff]  ;;  %v272_v62 = vld [vmem:[#allocation2 + $0x70] sm:$0xff] }
  0x15   :  { %147 = vmatpush.msra.mxu2 %v126_v13  ;;  %v159_v21 = vsel %vm158_vm4, %v157_v20, -inf  ;;  %291 = vmatpush.msrb.mxu0 %v273_v61  ;;  %v271_v63 = vld [vmem:[#allocation2 + $0x68] sm:$0xff]  ;;  %v270_v0 = vld [vmem:[#allocation2 + $0x60] sm:$0xff] }
  0x16   :  { %112 = vmatpush.msra.mxu1 %v87_v6  ;;  %160 = vmax.xlane.f32.xlu0 %v159_v21 }
  0x17   :  { %148 = vmatpush.msra.mxu2 %v125_v14  ;;  %259 = vmatpush.msra.mxu3 %v234_v44 }
  0x18   :  { %292 = vmatpush.msrb.mxu0 %v272_v62 }
  0x1a   :  { %293 = vmatpush.msrb.mxu0 %v271_v63 }
  0x1c   :  { %294 = vmatpush.msrb.mxu0 %v270_v0 }
  0x89   :  { %v161_v26 = vpop.xlane.xlu0 %160 }
  0x8a   :  { %vm162_vm6 = vcmp.gt.f32.partialorder %v161_v26, 0.0 }
  0x8b   :  { %vm163_vm9 = vmxor %vm162_vm6, %vm506_vm8 }
  0x8c   :  { %vm167_vm10 = vmand %vm163_vm9, %vm164_vm7 }
  0x8d   :  { %vm168_vm11 = vmor %vm550_vm5, %vm167_vm10  ;;  %vm300_vm5 = vcmp.lt.s32.totalorder %v543_v17, 10  ;;  %vm309_vm10 = vcmp.eq.s32.totalorder %v543_v17, 6 }
  0x8e   :  { %v83_v9 = vpop.f32.mrf.mxu0  ;;  %v169_v30 = vsel %vm168_vm11, 0.0, %v507_v29 }
  0x8f   :  { %v84_v10 = vadd.f32 %v407_v8, %v83_v9 }
  0x91   :  { %v86_v11 = vmax.f32 %v84_v10, 0.0 }
  0x93   :  { %389 = vmatmul.msk.f32.vlgmr.msra.gmra.mxu1 %vm93_vm1, %v86_v11 }
 0x110   :  { %v114_v23 = vpop.f32.mrf.mxu1 }
 0x111   :  { %v115_v24 = vadd.f32 %v408_v22, %v114_v23 }
 0x113   :  { %v124_v25 = vmax.f32 %v115_v24, 0.0 }
 0x115   :  { %390 = vmatmul.msk.f32.vlgmr.msra.gmra.mxu2 %vm93_vm1, %v124_v25 }
 0x198   :  { %v150_v28 = vpop.f32.mrf.mxu2 }
 0x199   :  { %v151_v31 = vadd.f32 %v563_v27, %v150_v28 }
 0x19b   :  { %v567_v32 = vsub.f32 %v151_v31, %v169_v30 }
 0x19d   :  { %v171_v33 = vsel %vm158_vm4, %v567_v32, -inf }
 0x19e   :  { %172 = vmax.xlane.f32.xlu0 %v171_v33 }
 0x211   :  { %v571_v34 = vpop.xlane.xlu0 %172 }
 0x212   :  { %vm200_vm12 = vcmp.eq.f32.partialorder %v567_v32, %v571_v34  ;;  %v174_v1 = vsub.f32 %v567_v32, %v571_v34 }
 0x213   :  { %v201_v35 = vsel %vm200_vm12, %v543_v17, 10 }
 0x214   :  { %v202_v36 = vsel %vm158_vm4, %v201_v35, 2147483647  ;;  %v175_v2 = vmul.f32 1.442695, %v174_v1 }
 0x215   :  { %v204_v37 = vshra.s32 %v202_v36, 16  ;;  %v203_v39 = vand.u32 65535, %v202_v36 }
 0x216   :  { %412 = vpow2.f32 %v175_v2 }
 0x217   :  { %v206_v38 = vcvt.s32.f32 %v204_v37  ;;  %v205_v41 = vcvt.s32.f32 %v203_v39 }
 0x219   :  { %207 = vmin.xlane.f32.xlu1 %v206_v38 }
 0x21c   :  { %v413_v3 = vpop.eup %412 }
 0x21d   :  { %v177_v4 = vsel %vm158_vm4, %v413_v3, 0.0 }
 0x28c   :  { %v208_v40 = vpop.xlane.xlu1 %207 }
 0x28d   :  { %vm209_vm13 = vcmp.eq.f32.partialorder %v206_v38, %v208_v40  ;;  %v214_v45 = vcvt.f32.s32 %v208_v40 }
 0x28e   :  { %v210_v42 = vsel %vm209_vm13, %v205_v41, inf }
 0x28f   :  { %211 = vmin.xlane.f32.xlu1 %v210_v42  ;;  %v215_v47 = vshll.u32 %v214_v45, 16 }
 0x302   :  { %v212_v46 = vpop.xlane.xlu1 %211 }
 0x303   :  { %v213_v48 = vcvt.f32.s32 %v212_v46 }
 0x305   :  { %v577_v49 = vadd.s32 %v215_v47, %v213_v48 }
 0x307   :  { %vm224_vm15 = vcmp.eq.s32.totalorder %v543_v17, %v577_v49 }
 0x308   :  { %v391_v52 = vsel %vm224_vm15, 1.0, %v505_v19 }
 0x309   :  { %v228_v53 = vsub.f32 %v391_v52, %v410_v50 }
 0x30b   :  { %v230_v54 = vmul.f32 %v411_v51, %v228_v53 }
 0x30d   :  { %v392_v55 = vclamps-f32 %v230_v54, 5.0 }
 0x30f   :  { %v233_v56 = vsel %vm154_vm3, %v392_v55, 0.0  ;;  %vm299_vm3 = vcmp.ge.s32.totalorder %v543_v17, 6 }
 0x310   :  { %394 = vmatmul.msk.f32.vlgmr.msra.gmra.mxu3 %vm236_vm0, %v233_v56  ;;  %vm301_vm6 = vmand %vm299_vm3, %vm300_vm5 }
 0x311   :  { %vm302_vm7 = vmand %vm121_vm2, %vm301_vm6 }
 0x312   :  { %v303_v5 = vsel %vm302_vm7, 1.0, %v505_v19 }
 0x313   :  { %v304_v6 = vsel %vm158_vm4, %v303_v5, -inf }
 0x314   :  { %305 = vmax.xlane.f32.xlu0 %v304_v6 }
 0x387   :  { %v306_v8 = vpop.xlane.xlu0 %305 }
 0x388   :  { %vm307_vm9 = vcmp.gt.f32.partialorder %v306_v8, 0.0 }
 0x389   :  { %vm308_vm11 = vmxor %vm307_vm9, %vm506_vm8  ;;  %vm371_vm9 = vcmask 7168  }
 0x38a   :  { %vm312_vm12 = vmand %vm308_vm11, %vm309_vm10  ;;  %vm373_vm10 = vcmask 15360   ;;  %vm375_vm11 = vcmask 23552  }
 0x38b   :  { %vm313_vm13 = vmor %vm302_vm7, %vm312_vm12  ;;  %vm377_vm12 = vcmask 31744  }
 0x38c   :  { %v314_v10 = vsel %vm313_vm13, 0.0, %v507_v29 }
 0x393   :  { %v261_v57 = vpop.f32.mrf.mxu3 }
 0x394   :  { %265 = vrot.lane.b32.xlu2 %v261_v57, %s508_s0 }
 0x3ee   :  { %v266_v58 = vpop.permute.xlu2 %265 }
 0x3ef   :  { %v268_v59 = vadd.f32 %v266_v58, %v115_v24 }
 0x3f1   :  { %v269_v60 = vmax.f32 %v268_v59, 0.0 }
 0x3f3   :  { %275 = vrot.lane.b32.xlu2 %v269_v60, %s509_s2 }
 0x41c   :  { %178 = vadd.xlane.f32.xlu2 %v177_v4 }
 0x44d   :  { %v276_v7 = vpop.permute.xlu2 %275 }
 0x44e   :  { %395 = vmatmul.msk.f32.vlgmr.msrb.gmra.mxu0 %vm93_vm1, %v276_v7 }
 0x48f   :  { %v179_v14 = vpop.xlane.xlu2 %178 }
 0x490   :  { %414 = vrcp.f32 %v179_v14  ;;  %v193_v22 = vand.u32 2147483648, %v179_v14  ;;  %vm187_vm2 = vweird.f32 %v179_v14  ;;  %v191_v23 = vand.u32 2147483647, %v179_v14 }
 0x491   :  { %416 = vlog2.f32 %v179_v14 }
 0x492   :  { %v194_v28 = vor.u32 1.1754944e-38, %v193_v22  ;;  %vm192_vm15 = vcmp.eq.f32.partialorder %v191_v23, 8.507059e+37 }
 0x496   :  { %v415_v15 = vpop.eup %414 }
 0x497   :  { %v183_v16 = vmul.f32 %v415_v15, %v179_v14  ;;  %vm188_vm1 = vweird.f32 %v415_v15  ;;  %v417_v21 = vpop.eup %416 }
 0x498   :  { %vm189_vm8 = vmor %vm187_vm2, %vm188_vm1  ;;  %v181_v26 = vmul.f32 0.6931472, %v417_v21 }
 0x499   :  { %v184_v18 = vsub.f32 1.0, %v183_v16 }
 0x49a   :  { %v198_v36 = vadd.f32 %v181_v26, %v571_v34  ;;  %v218_v52 = vsub.f32 0.0, %v181_v26 }
 0x49b   :  { %v185_v19 = vmul.f32 %v415_v15, %v184_v18 }
 0x49c   :  { %v199_v39 = vsub.f32 %v567_v32, %v198_v36 }
 0x49d   :  { %v186_v20 = vadd.f32 %v415_v15, %v185_v19 }
 0x4cb   :  { %v296_v9 = vpop.f32.mrf.mxu0 }
 0x4cc   :  { %v297_v11 = vadd.f32 %v563_v27, %v296_v9  ;;  %v190_v27 = vsel %vm189_vm8, %v415_v15, %v186_v20  ;;  %v217_v9 = vcvt.s32.f32 %v577_v49 }
 0x4cd   :  { %v195_v35 = vsel %vm192_vm15, %v194_v28, %v190_v27 }
 0x4ce   :  { %v598_v12 = vsub.f32 %v297_v11, %v314_v10  ;;  %v197_v38 = vmul.f32 %v413_v3, %v195_v35 }
 0x4d0   :  { %v316_v13 = vsel %vm158_vm4, %v598_v12, -inf  ;;  %v219_v41 = vmul.f32 %v199_v39, %v197_v38 }
 0x4d1   :  { %317 = vmax.xlane.f32.xlu1 %v316_v13 }
 0x544   :  { %v318_v24 = vpop.xlane.xlu1 %317 }
 0x545   :  { %v319_v25 = vsub.f32 %v598_v12, %v318_v24  ;;  %vm345_vm14 = vcmp.eq.f32.partialorder %v598_v12, %v318_v24 }
 0x546   :  { %v346_v29 = vsel %vm345_vm14, %v543_v17, 10  ;;  %v220_v17 = vsel %vm158_vm4, %v219_v41, 0.0 }
 0x547   :  { %v320_v30 = vmul.f32 1.442695, %v319_v25  ;;  %v347_v31 = vsel %vm158_vm4, %v346_v29, 2147483647 }
 0x548   :  { %v349_v33 = vshra.s32 %v347_v31, 16  ;;  %v348_v43 = vand.u32 65535, %v347_v31 }
 0x549   :  { %418 = vpow2.f32 %v320_v30 }
 0x54a   :  { %v351_v37 = vcvt.s32.f32 %v349_v33  ;;  %v350_v45 = vcvt.s32.f32 %v348_v43 }
 0x54c   :  { %352 = vmin.xlane.f32.xlu1 %v351_v37 }
 0x54f   :  { %v419_v40 = vpop.eup %418 }
 0x550   :  { %v322_v42 = vsel %vm158_vm4, %v419_v40, 0.0 }
 0x551   :  { %323 = vadd.xlane.f32.xlu0 %v322_v42 }
 0x554   :  { %221 = vadd.xlane.f32.xlu1 %v220_v17 }
 0x5bf   :  { %v353_v44 = vpop.xlane.xlu1 %352 }
 0x5c0   :  { %vm354_vm0 = vcmp.eq.f32.partialorder %v351_v37, %v353_v44  ;;  %v359_v3 = vcvt.f32.s32 %v353_v44 }
 0x5c1   :  { %v355_v46 = vsel %vm354_vm0, %v350_v45, inf }
 0x5c2   :  { %356 = vmin.xlane.f32.xlu0 %v355_v46  ;;  %v360_v5 = vshll.u32 %v359_v3, 16 }
 0x5c4   :  { %v324_v34 = vpop.xlane.xlu0 %323 }
 0x5c5   :  { %420 = vrcp.f32 %v324_v34  ;;  %v338_v53 = vand.u32 2147483648, %v324_v34  ;;  %v336_v56 = vand.u32 2147483647, %v324_v34  ;;  %vm332_vm5 = vweird.f32 %v324_v34 }
 0x5c6   :  { %422 = vlog2.f32 %v324_v34 }
 0x5c7   :  { %v339_v60 = vor.u32 1.1754944e-38, %v338_v53  ;;  %vm337_vm7 = vcmp.eq.f32.partialorder %v336_v56, 8.507059e+37  ;;  %v222_v14 = vpop.xlane.xlu1 %221 }
 0x5cb   :  { %v421_v47 = vpop.eup %420 }
 0x5cc   :  { %v423_v48 = vpop.eup %422  ;;  %v328_v32 = vmul.f32 %v421_v47, %v324_v34  ;;  %vm333_vm3 = vweird.f32 %v421_v47 }
 0x5cd   :  { %v326_v50 = vmul.f32 0.6931472, %v423_v48  ;;  %vm334_vm6 = vmor %vm332_vm5, %vm333_vm3 }
 0x5ce   :  { %v329_v51 = vsub.f32 1.0, %v328_v32 }
 0x5cf   :  { %v364_v54 = vsub.f32 0.0, %v326_v50  ;;  %v343_v59 = vadd.f32 %v326_v50, %v318_v24 }
 0x5d0   :  { %v330_v55 = vmul.f32 %v421_v47, %v329_v51 }
 0x5d1   :  { %v370_v57 = vadd.f32 %v364_v54, %v218_v52  ;;  %v344_v0 = vsub.f32 %v598_v12, %v343_v59  ;;  %v223_v12 = vsub.f32 0.0, %v222_v14 }
 0x5d2   :  { %v331_v58 = vadd.f32 %v421_v47, %v330_v55 }
 0x5d4   :  { %v335_v61 = vsel %vm334_vm6, %v421_v47, %v331_v58 }
 0x5d5   :  { %v340_v62 = vsel %vm337_vm7, %v339_v60, %v335_v61 }
 0x5d6   :  { %v342_v63 = vmul.f32 %v419_v40, %v340_v62 }
 0x5d8   :  { %v365_v1 = vmul.f32 %v344_v0, %v342_v63 }
 0x5da   :  { %v366_v2 = vsel %vm158_vm4, %v365_v1, 0.0  ;;  %vm379_vm4 = vcmask 39936  }
 0x5db   :  { %367 = vadd.xlane.f32.xlu0 %v366_v2 }
 0x635   :  { %v357_v4 = vpop.xlane.xlu0 %356 }
 0x636   :  { %v358_v6 = vcvt.f32.s32 %v357_v4 }
 0x638   :  { %v361_v7 = vadd.s32 %v360_v5, %v358_v6 }
 0x63a   :  { %v396_v8 = vadd.s32 4294967290, %v361_v7 }
 0x63c   :  { %v363_v10 = vcvt.s32.f32 %v396_v8 }
 0x63e   :  { %v372_v11 = vsel %vm371_vm9, %v217_v9, %v363_v10 }
 0x63f   :  { %v374_v13 = vsel %vm373_vm10, %v372_v11, %v370_v57 }
 0x640   :  { %v376_v18 = vsel %vm375_vm11, %v374_v13, %v223_v12 }
 0x64e   :  { %v368_v15 = vpop.xlane.xlu0 %367 }
 0x64f   :  { %v369_v16 = vsub.f32 0.0, %v368_v15 }
 0x651   :  { %v378_v19 = vsel %vm377_vm12, %v376_v18, %v369_v16 }
 0x652   :  { %v380_v20 = vsel %vm379_vm4, %v378_v19, 0.0 }
 0x653   :  { %381 = vst [vmem:[%s619_s3] sm:$0xf] %v380_v20 }
 0x654   :  { %386 = vsyncpa [#allocation3], 1 }
 0x655   :  { %387 = vsyncpa [#allocation5], 1 }

</bundles_post_ra>
